<compile_context>
chip_gen: v7x
topology: tpu7x:2x2x1
jax: 0.10.0
libtpu: 0.0.40
codegen_flags: <defaults>
</compile_context>

<pallas_src>
import jax
import jax.numpy as jnp
from jax.experimental import pallas as pl
from jax.experimental.pallas import tpu as pltpu


def _round_up(x: int, m: int) -> int:
    return ((x + m - 1) // m) * m


def _make_mlp_kernel(n_layers: int):
    """Fused-MLP kernel body for `n_layers` Linear layers.

    ref order: x, (w0, b0), ..., (w_{L-1}, b_{L-1}), out
      * hidden-layer weights: bf16 (in_dim, out_dim); biases: f32 (1, out_dim)
      * final-layer weight:   f32 (1, hidden_last);   bias:  f32 (1, 1)
    ReLU after every Linear except the last; Dropout == identity at inference.
    """

    def kernel(*refs):
        x_ref = refs[0]
        out_ref = refs[-1]
        p = refs[1:-1]

        if n_layers == 1:
            h32 = x_ref[...].astype(jnp.float32)
        else:
            h_bf = x_ref[...]  # (TB, in_dim) bf16
            h32 = None
            for i in range(n_layers - 1):
                w = p[2 * i][...]        # (d_in, d_out) bf16 -> MXU
                b = p[2 * i + 1][...]    # (1, d_out) f32
                h32 = jnp.dot(h_bf, w, preferred_element_type=jnp.float32) + b
                h32 = jnp.maximum(h32, 0.0)          # ReLU; Dropout = identity (eval)
                if i < n_layers - 2:
                    h_bf = h32.astype(jnp.bfloat16)  # next MXU pass in bf16

        # Final Linear(d_last, 1): VPU broadcast-multiply + lane reduction
        # (avoids a badly-shaped N=1 MXU matmul).
        w_last = p[2 * (n_layers - 1)][...]      # (1, d_last) f32
        b_last = p[2 * (n_layers - 1) + 1][...]  # (1, 1) f32
        y = jnp.sum(h32 * w_last, axis=-1, keepdims=True) + b_last  # (TB, 1) f32
        out_ref[...] = y.astype(out_ref.dtype)

    return kernel


def interaction_classifier_forward(x, params, *, block_rows=None):
    """Forward pass of InteractionClassifier.

    x:      (B, input_dim) float array.
    params: list of (W, b); W: (in_dim, out_dim) (already transposed vs PyTorch's
            nn.Linear (out_dim, in_dim) storage), b: (out_dim,). Last out_dim == 1.
    Returns the squeezed output: shape (B,) for B > 1, scalar for B == 1
    (matching torch `.squeeze()`).
    """
    B, input_dim = x.shape
    n_layers = len(params)

    # Batch tile: multiple of 128 rows, capped at 2048. With the tiny feature
    # widths here this is ~128 KiB/bf16 x-tile, far under the scoped-VMEM limit
    # even with double buffering on v7x (64 MiB physical / 32 MiB default scoped);
    # pass block_rows explicitly to tune for very wide input_dim.
    if block_rows is None:
        TB = min(2048, _round_up(B, 128))
    else:
        TB = _round_up(block_rows, 8)
    B_pad = _round_up(B, TB)
    num_tiles = B_pad // TB

    x_p = x if B_pad == B else jnp.pad(x, ((0, B_pad - B), (0, 0)))
    x_bf = x_p.astype(jnp.bfloat16)  # halve HBM bytes of the dominant stream

    kernel = _make_mlp_kernel(n_layers)

    flat_args = [x_bf]
    in_specs = [pl.BlockSpec((TB, input_dim), lambda i: (i, 0))]
    for li, (w, b) in enumerate(params):
        if li < n_layers - 1:
            w_a = w.astype(jnp.bfloat16)                 # MXU input
            b_a = b.reshape(1, -1).astype(jnp.float32)   # bias added on f32 acc
        else:
            w_a = w.reshape(1, -1).astype(jnp.float32)   # (1, d_last) VPU path
            b_a = b.reshape(1, -1).astype(jnp.float32)   # (1, 1)
        flat_args.extend([w_a, b_a])
        # Constant block index -> weights/biases stay VMEM-resident across the grid.
        in_specs.append(pl.BlockSpec(w_a.shape, lambda i: (0, 0)))
        in_specs.append(pl.BlockSpec(b_a.shape, lambda i: (0, 0)))

    # Advisory cost estimate so XLA can overlap neighbours with this custom call.
    dims = [input_dim] + [w.shape[1] for (w, _) in params]
    flops = sum(2 * B_pad * dims[i] * dims[i + 1] for i in range(n_layers))
    bytes_accessed = int(
        x_bf.size * x_bf.dtype.itemsize          # x stream (bf16)
        + B_pad * 4                              # output (f32)
        + sum(a.size * a.dtype.itemsize for a in flat_args[1:])  # params
    )
    cost = pl.CostEstimate(flops=flops, transcendentals=0,
                           bytes_accessed=bytes_accessed)

    out = pl.pallas_call(
        kernel,
        out_shape=jax.ShapeDtypeStruct((B_pad, 1), jnp.float32),
        grid=(num_tiles,),
        in_specs=in_specs,
        out_specs=pl.BlockSpec((TB, 1), lambda i: (i, 0)),
        compiler_params=pltpu.CompilerParams(
            # Batch tiles are fully independent -> shard across both v7x
            # TensorCores; neutral on single-TC v5e/v6e.
            dimension_semantics=("parallel",),
        ),
        cost_estimate=cost,
    )(*flat_args)

    out = out[:B]            # drop padded rows
    return jnp.squeeze(out)  # (B,) for B > 1, scalar for B == 1 (torch .squeeze())


def init_params(key, input_dim, hidden_sizes):
    """Deterministic parameter init matching the module's layer shapes.

    Returns list of (W, b) with W: (in_dim, out_dim) — already transposed
    vs. PyTorch's (out_dim, in_dim) storage.
    """
    dims = [input_dim] + list(hidden_sizes) + [1]
    params = []
    for i in range(len(dims) - 1):
        in_d, out_d = dims[i], dims[i + 1]
        key, kw, kb = jax.random.split(key, 3)
        bound = float(in_d) ** -0.5
        w = jax.random.uniform(kw, (in_d, out_d), jnp.float32, -bound, bound)
        b = jax.random.uniform(kb, (out_d,), jnp.float32, -bound, bound)
        params.append((w, b))
    return params


def reference_forward(x, params):
    """Pure-JAX reference mirroring the kernel's dtype strategy
    (bf16 matmul inputs, f32 accumulation, f32 final layer)."""
    n = len(params)
    h_bf = x.astype(jnp.bfloat16)
    h32 = x.astype(jnp.float32)
    for (w, b) in params[:-1]:
        h32 = jnp.dot(h_bf, w.astype(jnp.bfloat16),
                      preferred_element_type=jnp.float32) + b
        h32 = jnp.maximum(h32, 0.0)
        h_bf = h32.astype(jnp.bfloat16)
    w_l, b_l = params[-1]
    y = jnp.sum(h32 * w_l[:, 0][None, :], axis=-1) + b_l[0]
    return jnp.squeeze(y)


if __name__ == "__main__":
    # Small shapes consistent with the module's forward: x is (batch, input_dim).
    batch = 8
    input_dim = 32
    hidden_sizes = [64, 32]
    dropout = 0.1  # identity at inference

    key = jax.random.PRNGKey(0)
    key, kx = jax.random.split(key)
    x = jax.random.normal(kx, (batch, input_dim), jnp.float32)
    params = init_params(key, input_dim, hidden_sizes)

    out = interaction_classifier_forward(x, params)
    out = jax.block_until_ready(out)

    ref = reference_forward(x, params)
    assert out.shape == (batch,), f"bad output shape {out.shape}"
    err = float(jnp.max(jnp.abs(out - ref)))
    assert jnp.allclose(out, ref, atol=1e-3, rtol=1e-3), f"mismatch vs reference: {err}"

    print("KERNEL_OK")
</pallas_src>

<mosaic_0001>
module attributes {stable_mosaic.version = 11 : i64} {
  func.func @kernel(%arg0: i32, %arg1: memref<128x32xbf16, #tpu.memory_space<vmem>>, %arg2: memref<32x64xbf16, #tpu.memory_space<vmem>>, %arg3: memref<1x64xf32, #tpu.memory_space<vmem>>, %arg4: memref<64x32xbf16, #tpu.memory_space<vmem>>, %arg5: memref<1x32xf32, #tpu.memory_space<vmem>>, %arg6: memref<1x32xf32, #tpu.memory_space<vmem>>, %arg7: memref<1x1xf32, #tpu.memory_space<vmem>>, %arg8: memref<128x1xf32, #tpu.memory_space<vmem>>) attributes {dimension_semantics = [#tpu.dimension_semantics<parallel>], iteration_bounds = array<i64: 1>, scalar_prefetch = 0 : i64, scratch_operands = 0 : i64, tpu.core_type = #tpu.core_type<tc>, window_params = [{transform_indices = @transform_0, window_bounds = array<i64: 128, 32>}, {pipeline_mode = #tpu.pipeline_mode<synchronous>, transform_indices = @transform_1, window_bounds = array<i64: 32, 64>}, {pipeline_mode = #tpu.pipeline_mode<synchronous>, transform_indices = @transform_2, window_bounds = array<i64: 1, 64>}, {pipeline_mode = #tpu.pipeline_mode<synchronous>, transform_indices = @transform_3, window_bounds = array<i64: 64, 32>}, {pipeline_mode = #tpu.pipeline_mode<synchronous>, transform_indices = @transform_4, window_bounds = array<i64: 1, 32>}, {pipeline_mode = #tpu.pipeline_mode<synchronous>, transform_indices = @transform_5, window_bounds = array<i64: 1, 32>}, {pipeline_mode = #tpu.pipeline_mode<synchronous>, transform_indices = @transform_6, window_bounds = array<i64: 1, 1>}, {transform_indices = @transform_7, window_bounds = array<i64: 128, 1>}]} {
    %c0 = arith.constant 0 : index
    %c0_0 = arith.constant 0 : index
    %0 = vector.load %arg1[%c0, %c0_0] : memref<128x32xbf16, #tpu.memory_space<vmem>>, vector<128x32xbf16>
    %c0_1 = arith.constant 0 : index
    %c0_2 = arith.constant 0 : index
    %1 = vector.load %arg2[%c0_1, %c0_2] : memref<32x64xbf16, #tpu.memory_space<vmem>>, vector<32x64xbf16>
    %c0_3 = arith.constant 0 : index
    %c0_4 = arith.constant 0 : index
    %2 = vector.load %arg3[%c0_3, %c0_4] : memref<1x64xf32, #tpu.memory_space<vmem>>, vector<1x64xf32>
    %cst = arith.constant dense<0.000000e+00> : vector<128x64xf32>
    %3 = tpu.matmul %0, %1, %cst {dimension_numbers = #tpu.dot_dimension_numbers<[1], [0], [0], [1], [0, 0, 1, 1], [], []>} : vector<128x32xbf16>, vector<32x64xbf16>, vector<128x64xf32> -> vector<128x64xf32>
    %4 = vector.broadcast %2 : vector<1x64xf32> to vector<128x64xf32>
    %5 = arith.addf %3, %4 : vector<128x64xf32>
    %cst_5 = arith.constant 0.000000e+00 : f32
    %6 = vector.broadcast %cst_5 : f32 to vector<128x64xf32>
    %7 = arith.maximumf %5, %6 : vector<128x64xf32>
    %8 = arith.truncf %7 : vector<128x64xf32> to vector<128x64xbf16>
    %c0_6 = arith.constant 0 : index
    %c0_7 = arith.constant 0 : index
    %9 = vector.load %arg4[%c0_6, %c0_7] : memref<64x32xbf16, #tpu.memory_space<vmem>>, vector<64x32xbf16>
    %c0_8 = arith.constant 0 : index
    %c0_9 = arith.constant 0 : index
    %10 = vector.load %arg5[%c0_8, %c0_9] : memref<1x32xf32, #tpu.memory_space<vmem>>, vector<1x32xf32>
    %cst_10 = arith.constant dense<0.000000e+00> : vector<128x32xf32>
    %11 = tpu.matmul %8, %9, %cst_10 {dimension_numbers = #tpu.dot_dimension_numbers<[1], [0], [0], [1], [0, 0, 1, 1], [], []>} : vector<128x64xbf16>, vector<64x32xbf16>, vector<128x32xf32> -> vector<128x32xf32>
    %12 = vector.broadcast %10 : vector<1x32xf32> to vector<128x32xf32>
    %13 = arith.addf %11, %12 : vector<128x32xf32>
    %cst_11 = arith.constant 0.000000e+00 : f32
    %14 = vector.broadcast %cst_11 : f32 to vector<128x32xf32>
    %15 = arith.maximumf %13, %14 : vector<128x32xf32>
    %c0_12 = arith.constant 0 : index
    %c0_13 = arith.constant 0 : index
    %16 = vector.load %arg6[%c0_12, %c0_13] : memref<1x32xf32, #tpu.memory_space<vmem>>, vector<1x32xf32>
    %c0_14 = arith.constant 0 : index
    %c0_15 = arith.constant 0 : index
    %17 = vector.load %arg7[%c0_14, %c0_15] : memref<1x1xf32, #tpu.memory_space<vmem>>, vector<1x1xf32>
    %18 = vector.broadcast %16 : vector<1x32xf32> to vector<128x32xf32>
    %19 = arith.mulf %15, %18 : vector<128x32xf32>
    %cst_16 = arith.constant dense<0.000000e+00> : vector<128xf32>
    %20 = vector.multi_reduction <add>, %19, %cst_16 [1] : vector<128x32xf32> to vector<128xf32>
    %21 = vector.shape_cast %20 : vector<128xf32> to vector<128x1xf32>
    %22 = vector.broadcast %17 : vector<1x1xf32> to vector<128x1xf32>
    %23 = arith.addf %21, %22 : vector<128x1xf32>
    %c0_17 = arith.constant 0 : index
    %c0_18 = arith.constant 0 : index
    %24 = vector.load %arg8[%c0_17, %c0_18] : memref<128x1xf32, #tpu.memory_space<vmem>>, vector<128x1xf32>
    tpu.vector_store %arg8[%c0_17, %c0_18], %23 {strides = array<i32>} : memref<128x1xf32, #tpu.memory_space<vmem>>, vector<128x1xf32>,
    return
  }
  func.func @transform_0(%arg0: i32) -> (i32, i32) {
    %c0_i32 = arith.constant 0 : i32
    %c0_i32_0 = arith.constant 0 : i32
    return %arg0, %c0_i32 : i32, i32
  }
  func.func @transform_1(%arg0: i32) -> (i32, i32) {
    %c0_i32 = arith.constant 0 : i32
    %c0_i32_0 = arith.constant 0 : i32
    %c0_i32_1 = arith.constant 0 : i32
    return %c0_i32, %c0_i32_0 : i32, i32
  }
  func.func @transform_2(%arg0: i32) -> (i32, i32) {
    %c0_i32 = arith.constant 0 : i32
    %c0_i32_0 = arith.constant 0 : i32
    %c0_i32_1 = arith.constant 0 : i32
    return %c0_i32, %c0_i32_0 : i32, i32
  }
  func.func @transform_3(%arg0: i32) -> (i32, i32) {
    %c0_i32 = arith.constant 0 : i32
    %c0_i32_0 = arith.constant 0 : i32
    %c0_i32_1 = arith.constant 0 : i32
    return %c0_i32, %c0_i32_0 : i32, i32
  }
  func.func @transform_4(%arg0: i32) -> (i32, i32) {
    %c0_i32 = arith.constant 0 : i32
    %c0_i32_0 = arith.constant 0 : i32
    %c0_i32_1 = arith.constant 0 : i32
    return %c0_i32, %c0_i32_0 : i32, i32
  }
  func.func @transform_5(%arg0: i32) -> (i32, i32) {
    %c0_i32 = arith.constant 0 : i32
    %c0_i32_0 = arith.constant 0 : i32
    %c0_i32_1 = arith.constant 0 : i32
    return %c0_i32, %c0_i32_0 : i32, i32
  }
  func.func @transform_6(%arg0: i32) -> (i32, i32) {
    %c0_i32 = arith.constant 0 : i32
    %c0_i32_0 = arith.constant 0 : i32
    %c0_i32_1 = arith.constant 0 : i32
    return %c0_i32, %c0_i32_0 : i32, i32
  }
  func.func @transform_7(%arg0: i32) -> (i32, i32) {
    %c0_i32 = arith.constant 0 : i32
    %c0_i32_0 = arith.constant 0 : i32
    return %arg0, %c0_i32 : i32, i32
  }
}

</mosaic_0001>

<bundles_post_ra>
// kernel: tpu_custom_call.1
= control target key start
LH: loop header
LB: loop body
LE: loop exit
PB: predicated region body
PF: predicated region fallthrough
CT: control target
= control target key end

     0   :  { %vm108_vm0 = vcmask 261120   ;;  %vm293_vm1 = vcmask 523264   ;;  %vm525_vm2 = vcmask 7168   ;;  %s886_s1 = inlined_call_operand.vmem [shape: bf16[32,64], index: 1, kind: input, shape index: {}]   ;;  %s887_s0 = inlined_call_operand.vmem [shape: bf16[128,32], index: 0, kind: input, shape index: {}]   ;;  %s888_s3 = inlined_call_operand.vmem [shape: bf16[64,32], index: 3, kind: input, shape index: {}]   ;;  %s889_s2 = inlined_call_operand.vmem [shape: f32[1,64], index: 2, kind: input, shape index: {}]   ;;  %s890_s6 = inlined_call_operand.<no memory space> [shape: f32[1,1], index: 6, kind: input, shape index: {}]   ;;  %s891_s4 = inlined_call_operand.vmem [shape: f32[1,32], index: 4, kind: input, shape index: {}]   ;;  %s892_s5 = inlined_call_operand.vmem [shape: f32[1,32], index: 5, kind: input, shape index: {}]   ;;  %s893_s7 = inlined_call_operand.vmem [shape: f32[128,1], index: 7, kind: output, shape index: {}]  }
   0x1   :  { %v646_v0 = vld [vmem:[%s886_s1] sm:$0xff]   ;;  %v647_v1 = vld [vmem:[%s886_s1 + $0x8] sm:$0xff]   ;;  %v650_v4 = vld [vmem:[%s887_s0 + $0x10] sm:$0xff]  }
   0x2   :  { %602 = vmatprep.subr.bf16.mxu0 %v646_v0  ;;  %v648_v2 = vld [vmem:[%s887_s0] sm:$0xff]   ;;  %v649_v3 = vld [vmem:[%s887_s0 + $0x8] sm:$0xff]   ;;  %v651_v7 = vld [vmem:[%s887_s0 + $0x18] sm:$0xff]  }
   0x3   :  { %603 = vmatpush3.bf16.msra.mxu0 %v646_v0  ;;  %606 = vmatprep.mubr.msk.bf16.mxu0 %vm108_vm0, %v648_v2  ;;  %v656_v5 = vld [vmem:[%s888_s3] sm:$0xff]   ;;  %v657_v6 = vld [vmem:[%s888_s3 + $0x8] sm:$0xff]   ;;  %v654_v10 = vld [vmem:[%s887_s0 + $0x30] sm:$0xff]  }
   0x4   :  { %604 = vmatprep.subr.bf16.mxu0 %v647_v1  ;;  %622 = vmatprep.subr.bf16.mxu1 %v656_v5  ;;  %v652_v8 = vld [vmem:[%s887_s0 + $0x20] sm:$0xff]   ;;  %v653_v9 = vld [vmem:[%s887_s0 + $0x28] sm:$0xff]   ;;  %v655_v11 = vld [vmem:[%s887_s0 + $0x38] sm:$0xff]  }
   0x5   :  { %623 = vmatpush3.bf16.msra.mxu1 %v656_v5  ;;  %v658_v12 = vld [vmem:[%s888_s3 + $0x10] sm:$0xff]   ;;  %v659_v13 = vld [vmem:[%s888_s3 + $0x18] sm:$0xff]   ;;  %v546_v14 = vld [vmem:[%s889_s2] ss:$0 sm:$0xff] }
   0x6   :  { %624 = vmatprep.subr.bf16.mxu1 %v657_v6 }
   0x7   :  { %605 = vmatpush3.bf16.msra.mxu0 %v647_v1 }
   0x9   :  { %625 = vmatpush3.bf16.msra.mxu1 %v657_v6 }
   0xa   :  { %607 = vmatmul.mubr.msk.bf16.vlgmr.msra.gmra.mrb[0].mxu0 %vm108_vm0, %v649_v3  ;;  %626 = vmatprep.subr.bf16.mxu1 %v658_v12 }
   0xb   :  { %610 = vmatprep.mubr.msk.bf16.mxu0 %vm108_vm0, %v650_v4 }
   0xd   :  { %627 = vmatpush3.bf16.msra.mxu1 %v658_v12 }
   0xe   :  { %628 = vmatprep.subr.bf16.mxu1 %v659_v13 }
  0x11   :  { %629 = vmatpush3.bf16.msra.mxu1 %v659_v13 }
  0x12   :  { %611 = vmatmul.mubr.msk.bf16.gmra.mrb[4].mxu0 %vm108_vm0, %v651_v7  ;;  %v12_v7 = vstv %s890_s6 }
  0x13   :  { %614 = vmatprep.mubr.msk.bf16.mxu0 %vm108_vm0, %v652_v8  ;;  %13 = vst [vmem:[#allocation2] sm:$0x1] %v12_v7  ;;  %v767_v8 = vld [vmem:[%s891_s4] ss:$0 sm:$0xff] }
  0x1a   :  { %615 = vmatmul.mubr.msk.bf16.gmra.mrb[8].mxu0 %vm108_vm0, %v653_v9 }
  0x1b   :  { %618 = vmatprep.mubr.msk.bf16.mxu0 %vm108_vm0, %v654_v10 }
  0x22   :  { %619 = vmatmul.mubr.msk.bf16.gmra.mrb[12].mxu0 %vm108_vm0, %v655_v11 }
  0xdd   :  { %v608_v15 = vpop.f32.mrb[0].mxu0 }
  0xde   :  { %v176_v16 = vadd.f32 %v608_v15, %v546_v14  ;;  %v167_v17 = vpop.f32.mrb[1].mxu0 }
  0xdf   :  { %v168_v18 = vadd.f32 %v546_v14, %v167_v17  ;;  %v609_v19 = vpop.f32.mrb[2].mxu0 }
  0xe0   :  { %v179_v20 = vadd.f32 %v609_v19, %v546_v14  ;;  %v170_v21 = vpop.f32.mrb[3].mxu0  ;;  %v232_v23 = vmax.f32 %v176_v16, 0.0 }
  0xe1   :  { %v171_v22 = vadd.f32 %v546_v14, %v170_v21  ;;  %v230_v25 = vmax.f32 %v168_v18, 0.0 }
  0xe2   :  { %v233_v24 = vmax.f32 %v179_v20, 0.0 }
  0xe3   :  { %v231_v26 = vmax.f32 %v171_v22, 0.0 }
  0xe4   :  { %v247_v27 = vpack.c.bf16 %v233_v24, %v232_v23 }
  0xe5   :  { %v612_v28 = vpop.f32.mrb[4].mxu0  ;;  %v246_v29 = vpack.c.bf16 %v231_v26, %v230_v25 }
  0xe6   :  { %v192_v30 = vadd.f32 %v612_v28, %v546_v14  ;;  %v183_v31 = vpop.f32.mrb[5].mxu0 }
  0xe7   :  { %v184_v32 = vadd.f32 %v546_v14, %v183_v31  ;;  %v613_v33 = vpop.f32.mrb[6].mxu0  ;;  %630 = vmatprep.mubr.msk.bf16.mxu1 %vm293_vm1, %v246_v29 }
  0xe8   :  { %v195_v34 = vadd.f32 %v613_v33, %v546_v14  ;;  %v186_v35 = vpop.f32.mrb[7].mxu0  ;;  %631 = vmatmul.mubr.msk.bf16.vlgmr.msra.gmra.mrb[0].mxu1 %vm293_vm1, %v247_v27  ;;  %v236_v37 = vmax.f32 %v192_v30, 0.0 }
  0xe9   :  { %v187_v36 = vadd.f32 %v546_v14, %v186_v35  ;;  %v234_v39 = vmax.f32 %v184_v32, 0.0 }
  0xea   :  { %v237_v38 = vmax.f32 %v195_v34, 0.0 }
  0xeb   :  { %v235_v40 = vmax.f32 %v187_v36, 0.0 }
  0xec   :  { %v249_v41 = vpack.c.bf16 %v237_v38, %v236_v37 }
  0xed   :  { %v248_v42 = vpack.c.bf16 %v235_v40, %v234_v39  ;;  %v616_v43 = vpop.f32.mrb[8].mxu0 }
  0xee   :  { %v208_v44 = vadd.f32 %v616_v43, %v546_v14  ;;  %v199_v45 = vpop.f32.mrb[9].mxu0 }
  0xef   :  { %v200_v46 = vadd.f32 %v546_v14, %v199_v45  ;;  %v617_v47 = vpop.f32.mrb[10].mxu0  ;;  %634 = vmatprep.mubr.msk.bf16.mxu1 %vm293_vm1, %v248_v42 }
  0xf0   :  { %v211_v48 = vadd.f32 %v617_v47, %v546_v14  ;;  %v202_v49 = vpop.f32.mrb[11].mxu0  ;;  %635 = vmatmul.mubr.msk.bf16.gmra.mrb[4].mxu1 %vm293_vm1, %v249_v41  ;;  %v240_v51 = vmax.f32 %v208_v44, 0.0 }
  0xf1   :  { %v203_v50 = vadd.f32 %v546_v14, %v202_v49  ;;  %v238_v53 = vmax.f32 %v200_v46, 0.0 }
  0xf2   :  { %v241_v52 = vmax.f32 %v211_v48, 0.0 }
  0xf3   :  { %v239_v54 = vmax.f32 %v203_v50, 0.0 }
  0xf4   :  { %v251_v55 = vpack.c.bf16 %v241_v52, %v240_v51 }
  0xf5   :  { %v250_v56 = vpack.c.bf16 %v239_v54, %v238_v53  ;;  %v620_v57 = vpop.f32.mrb[12].mxu0 }
  0xf6   :  { %v224_v58 = vadd.f32 %v620_v57, %v546_v14  ;;  %v215_v59 = vpop.f32.mrb[13].mxu0 }
  0xf7   :  { %v216_v60 = vadd.f32 %v546_v14, %v215_v59  ;;  %v621_v61 = vpop.f32.mrb[14].mxu0  ;;  %638 = vmatprep.mubr.msk.bf16.mxu1 %vm293_vm1, %v250_v56 }
  0xf8   :  { %v227_v62 = vadd.f32 %v621_v61, %v546_v14  ;;  %v218_v63 = vpop.f32.mrb[15].mxu0  ;;  %639 = vmatmul.mubr.msk.bf16.gmra.mrb[8].mxu1 %vm293_vm1, %v251_v55  ;;  %v244_v1 = vmax.f32 %v224_v58, 0.0 }
  0xf9   :  { %v219_v0 = vadd.f32 %v546_v14, %v218_v63  ;;  %v242_v3 = vmax.f32 %v216_v60, 0.0  ;;  %v774_v14 = vld [vmem:[%s892_s5] ss:$0 sm:$0xff] }
  0xfa   :  { %v245_v2 = vmax.f32 %v227_v62, 0.0 }
  0xfb   :  { %v243_v4 = vmax.f32 %v219_v0, 0.0 }
  0xfc   :  { %v253_v5 = vpack.c.bf16 %v245_v2, %v244_v1 }
  0xfd   :  { %v252_v6 = vpack.c.bf16 %v243_v4, %v242_v3 }
  0xff   :  { %642 = vmatprep.mubr.msk.bf16.mxu1 %vm293_vm1, %v252_v6 }
 0x100   :  { %643 = vmatmul.mubr.msk.bf16.gmra.mrb[12].mxu1 %vm293_vm1, %v253_v5 }
 0x1bb   :  { %v632_v9 = vpop.f32.mrb[0].mxu1 }
 0x1bc   :  { %v361_v10 = vadd.f32 %v632_v9, %v767_v8  ;;  %v352_v11 = vpop.f32.mrb[1].mxu1 }
 0x1bd   :  { %v353_v12 = vadd.f32 %v767_v8, %v352_v11  ;;  %v633_v13 = vpop.f32.mrb[2].mxu1 }
 0x1be   :  { %v417_v15 = vmax.f32 %v361_v10, 0.0  ;;  %v364_v16 = vadd.f32 %v633_v13, %v767_v8  ;;  %v355_v17 = vpop.f32.mrb[3].mxu1 }
 0x1bf   :  { %v415_v18 = vmax.f32 %v353_v12, 0.0  ;;  %v356_v19 = vadd.f32 %v767_v8, %v355_v17 }
 0x1c0   :  { %v418_v20 = vmax.f32 %v364_v16, 0.0  ;;  %v441_v21 = vmul.f32 %v774_v14, %v417_v15 }
 0x1c1   :  { %v416_v22 = vmax.f32 %v356_v19, 0.0  ;;  %v439_v23 = vmul.f32 %v774_v14, %v415_v18 }
 0x1c2   :  { %v461_v24 = vsel %vm108_vm0, %v441_v21, 0.0  ;;  %v442_v25 = vmul.f32 %v774_v14, %v418_v20 }
 0x1c3   :  { %462 = vadd.xlane.f32.xlu1 %v461_v24  ;;  %v636_v26 = vpop.f32.mrb[4].mxu1  ;;  %v455_v27 = vsel %vm108_vm0, %v439_v23, 0.0  ;;  %v440_v28 = vmul.f32 %v774_v14, %v416_v22 }
 0x1c4   :  { %v377_v29 = vadd.f32 %v636_v26, %v767_v8  ;;  %v368_v30 = vpop.f32.mrb[5].mxu1  ;;  %456 = vadd.xlane.f32.xlu0 %v455_v27  ;;  %v464_v36 = vsel %vm108_vm0, %v442_v25, 0.0  ;;  %v579_v27 = vld [vmem:[#allocation2] ss:$0 sm:$0xff] }
 0x1c5   :  { %v369_v31 = vadd.f32 %v767_v8, %v368_v30  ;;  %v637_v32 = vpop.f32.mrb[6].mxu1  ;;  %v458_v39 = vsel %vm108_vm0, %v440_v28, 0.0 }
 0x1c6   :  { %v421_v33 = vmax.f32 %v377_v29, 0.0  ;;  %v380_v34 = vadd.f32 %v637_v32, %v767_v8  ;;  %v371_v35 = vpop.f32.mrb[7].mxu1 }
 0x1c7   :  { %v419_v37 = vmax.f32 %v369_v31, 0.0  ;;  %v372_v38 = vadd.f32 %v767_v8, %v371_v35  ;;  %465 = vadd.xlane.f32.xlu1 %v464_v36 }
 0x1c8   :  { %v422_v40 = vmax.f32 %v380_v34, 0.0  ;;  %459 = vadd.xlane.f32.xlu0 %v458_v39  ;;  %v445_v41 = vmul.f32 %v774_v14, %v421_v33 }
 0x1c9   :  { %v420_v42 = vmax.f32 %v372_v38, 0.0  ;;  %v443_v46 = vmul.f32 %v774_v14, %v419_v37 }
 0x1ca   :  { %v473_v43 = vsel %vm108_vm0, %v445_v41, 0.0  ;;  %v446_v44 = vmul.f32 %v774_v14, %v422_v40 }
 0x1cb   :  { %v640_v45 = vpop.f32.mrb[8].mxu1  ;;  %v444_v50 = vmul.f32 %v774_v14, %v420_v42  ;;  %v467_v58 = vsel %vm108_vm0, %v443_v46, 0.0 }
 0x1cc   :  { %v393_v47 = vadd.f32 %v640_v45, %v767_v8  ;;  %v384_v48 = vpop.f32.mrb[9].mxu1  ;;  %474 = vadd.xlane.f32.xlu0 %v473_v43  ;;  %v476_v49 = vsel %vm108_vm0, %v446_v44, 0.0 }
 0x1cd   :  { %v385_v51 = vadd.f32 %v767_v8, %v384_v48  ;;  %477 = vadd.xlane.f32.xlu1 %v476_v49  ;;  %v641_v52 = vpop.f32.mrb[10].mxu1  ;;  %v470_v60 = vsel %vm108_vm0, %v444_v50, 0.0 }
 0x1ce   :  { %v425_v53 = vmax.f32 %v393_v47, 0.0  ;;  %v396_v54 = vadd.f32 %v641_v52, %v767_v8  ;;  %v387_v55 = vpop.f32.mrb[11].mxu1 }
 0x1cf   :  { %v423_v56 = vmax.f32 %v385_v51, 0.0  ;;  %v388_v57 = vadd.f32 %v767_v8, %v387_v55 }
 0x1d0   :  { %v426_v59 = vmax.f32 %v396_v54, 0.0  ;;  %468 = vadd.xlane.f32.xlu0 %v467_v58  ;;  %v449_v61 = vmul.f32 %v774_v14, %v425_v53 }
 0x1d1   :  { %v424_v62 = vmax.f32 %v388_v57, 0.0  ;;  %471 = vadd.xlane.f32.xlu1 %v470_v60  ;;  %v447_v2 = vmul.f32 %v774_v14, %v423_v56 }
 0x1d2   :  { %v485_v63 = vsel %vm108_vm0, %v449_v61, 0.0  ;;  %v450_v0 = vmul.f32 %v774_v14, %v426_v59 }
 0x1d3   :  { %v644_v1 = vpop.f32.mrb[12].mxu1  ;;  %v448_v6 = vmul.f32 %v774_v14, %v424_v62  ;;  %v479_v16 = vsel %vm108_vm0, %v447_v2, 0.0 }
 0x1d4   :  { %v409_v3 = vadd.f32 %v644_v1, %v767_v8  ;;  %v400_v4 = vpop.f32.mrb[13].mxu1  ;;  %486 = vadd.xlane.f32.xlu0 %v485_v63  ;;  %v488_v5 = vsel %vm108_vm0, %v450_v0, 0.0 }
 0x1d5   :  { %v401_v7 = vadd.f32 %v767_v8, %v400_v4  ;;  %v645_v9 = vpop.f32.mrb[14].mxu1  ;;  %489 = vadd.xlane.f32.xlu1 %v488_v5  ;;  %v482_v17 = vsel %vm108_vm0, %v448_v6, 0.0 }
 0x1d6   :  { %v412_v10 = vadd.f32 %v645_v9, %v767_v8  ;;  %v403_v11 = vpop.f32.mrb[15].mxu1  ;;  %v429_v12 = vmax.f32 %v409_v3, 0.0 }
 0x1d7   :  { %v427_v13 = vmax.f32 %v401_v7, 0.0  ;;  %v404_v15 = vadd.f32 %v767_v8, %v403_v11 }
 0x1d8   :  { %480 = vadd.xlane.f32.xlu0 %v479_v16  ;;  %v430_v18 = vmax.f32 %v412_v10, 0.0  ;;  %v453_v23 = vmul.f32 %v774_v14, %v429_v12 }
 0x1d9   :  { %v428_v19 = vmax.f32 %v404_v15, 0.0  ;;  %483 = vadd.xlane.f32.xlu1 %v482_v17  ;;  %v451_v20 = vmul.f32 %v774_v14, %v427_v13 }
 0x1da   :  { %v454_v8 = vmul.f32 %v774_v14, %v430_v18  ;;  %v497_v25 = vsel %vm108_vm0, %v453_v23, 0.0 }
 0x1db   :  { %v491_v21 = vsel %vm108_vm0, %v451_v20, 0.0  ;;  %v452_v22 = vmul.f32 %v774_v14, %v428_v19 }
 0x1dc   :  { %492 = vadd.xlane.f32.xlu0 %v491_v21  ;;  %v500_v26 = vsel %vm108_vm0, %v454_v8, 0.0 }
 0x1dd   :  { %v494_v24 = vsel %vm108_vm0, %v452_v22, 0.0 }
 0x1de   :  { %495 = vadd.xlane.f32.xlu1 %v494_v24 }
 0x1e0   :  { %498 = vadd.xlane.f32.xlu0 %v497_v25 }
 0x1e2   :  { %501 = vadd.xlane.f32.xlu1 %v500_v26 }
 0x250   :  { %v463_v28 = vpop.xlane.xlu1 %462 }
 0x251   :  { %v511_v29 = vadd.f32 %v579_v27, %v463_v28  ;;  %v457_v30 = vpop.xlane.xlu0 %456 }
 0x252   :  { %v509_v31 = vadd.f32 %v579_v27, %v457_v30 }
 0x253   :  { %528 = vst.msk [vmem:[%s893_s7 + $0x10] sm:$0xff] %vm525_vm2, %v511_v29 }
 0x254   :  { %526 = vst.msk [vmem:[%s893_s7] sm:$0xff] %vm525_vm2, %v509_v31  ;;  %v466_v14 = vpop.xlane.xlu1 %465 }
 0x255   :  { %v512_v32 = vadd.f32 %v579_v27, %v466_v14  ;;  %v460_v33 = vpop.xlane.xlu0 %459 }
 0x256   :  { %v510_v34 = vadd.f32 %v579_v27, %v460_v33 }
 0x257   :  { %529 = vst.msk [vmem:[%s893_s7 + $0x18] sm:$0xff] %vm525_vm2, %v512_v32 }
 0x258   :  { %527 = vst.msk [vmem:[%s893_s7 + $0x8] sm:$0xff] %vm525_vm2, %v510_v34 }
 0x259   :  { %v475_v35 = vpop.xlane.xlu0 %474 }
 0x25a   :  { %v515_v36 = vadd.f32 %v579_v27, %v475_v35  ;;  %v478_v37 = vpop.xlane.xlu1 %477 }
 0x25b   :  { %v516_v38 = vadd.f32 %v579_v27, %v478_v37 }
 0x25c   :  { %532 = vst.msk [vmem:[%s893_s7 + $0x30] sm:$0xff] %vm525_vm2, %v515_v36 }
 0x25d   :  { %533 = vst.msk [vmem:[%s893_s7 + $0x38] sm:$0xff] %vm525_vm2, %v516_v38  ;;  %v469_v39 = vpop.xlane.xlu0 %468 }
 0x25e   :  { %v513_v40 = vadd.f32 %v579_v27, %v469_v39  ;;  %v472_v41 = vpop.xlane.xlu1 %471 }
 0x25f   :  { %v514_v42 = vadd.f32 %v579_v27, %v472_v41 }
 0x260   :  { %530 = vst.msk [vmem:[%s893_s7 + $0x20] sm:$0xff] %vm525_vm2, %v513_v40 }
 0x261   :  { %531 = vst.msk [vmem:[%s893_s7 + $0x28] sm:$0xff] %vm525_vm2, %v514_v42  ;;  %v487_v43 = vpop.xlane.xlu0 %486 }
 0x262   :  { %v519_v44 = vadd.f32 %v579_v27, %v487_v43  ;;  %v490_v45 = vpop.xlane.xlu1 %489 }
 0x263   :  { %v520_v46 = vadd.f32 %v579_v27, %v490_v45 }
 0x264   :  { %536 = vst.msk [vmem:[%s893_s7 + $0x50] sm:$0xff] %vm525_vm2, %v519_v44 }
 0x265   :  { %537 = vst.msk [vmem:[%s893_s7 + $0x58] sm:$0xff] %vm525_vm2, %v520_v46  ;;  %v481_v47 = vpop.xlane.xlu0 %480 }
 0x266   :  { %v517_v48 = vadd.f32 %v579_v27, %v481_v47  ;;  %v484_v49 = vpop.xlane.xlu1 %483 }
 0x267   :  { %v518_v50 = vadd.f32 %v579_v27, %v484_v49 }
 0x268   :  { %534 = vst.msk [vmem:[%s893_s7 + $0x40] sm:$0xff] %vm525_vm2, %v517_v48 }
 0x269   :  { %535 = vst.msk [vmem:[%s893_s7 + $0x48] sm:$0xff] %vm525_vm2, %v518_v50  ;;  %v493_v51 = vpop.xlane.xlu0 %492 }
 0x26a   :  { %v521_v52 = vadd.f32 %v579_v27, %v493_v51 }
 0x26b   :  { %v496_v53 = vpop.xlane.xlu1 %495 }
 0x26c   :  { %538 = vst.msk [vmem:[%s893_s7 + $0x60] sm:$0xff] %vm525_vm2, %v521_v52  ;;  %v522_v54 = vadd.f32 %v579_v27, %v496_v53 }
 0x26d   :  { %v499_v55 = vpop.xlane.xlu0 %498 }
 0x26e   :  { %539 = vst.msk [vmem:[%s893_s7 + $0x68] sm:$0xff] %vm525_vm2, %v522_v54  ;;  %v523_v56 = vadd.f32 %v579_v27, %v499_v55 }
 0x26f   :  { %v502_v57 = vpop.xlane.xlu1 %501 }
 0x270   :  { %540 = vst.msk [vmem:[%s893_s7 + $0x70] sm:$0xff] %vm525_vm2, %v523_v56  ;;  %v524_v58 = vadd.f32 %v579_v27, %v502_v57 }
 0x272   :  { %541 = vst.msk [vmem:[%s893_s7 + $0x78] sm:$0xff] %vm525_vm2, %v524_v58 }

</bundles_post_ra>
